<compile_context>
chip_gen: v7x
topology: tpu7x:2x2x1
jax: 0.10.0
libtpu: 0.0.40
codegen_flags: <defaults>
</compile_context>

<pallas_src>
import jax
import jax.numpy as jnp
from jax.experimental import pallas as pl
from jax.experimental.pallas import tpu as pltpu

LANE = 128       # TPU lane width
NEG_BIG = -1e30  # finite "minus infinity" baked into padded bias lanes


def _round_up(n, m):
    return ((n + m - 1) // m) * m


def policy_net_kernel(x_ref, w1_ref, b1_ref, w2_ref, b2_ref, out_ref):
    # x_ref:  (TB, input_size)
    # w1_ref: (input_size, HPAD)   b1_ref: (1, HPAD)
    # w2_ref: (HPAD, OPAD)         b2_ref: (1, OPAD)  (padded lanes == -1e30)
    # out_ref:(TB, out_size)       (narrow, real lanes only)
    x = x_ref[...]

    # fc1 + ReLU (f32 accumulation on the MXU, elementwise on the VPU).
    h = jnp.dot(x, w1_ref[...], preferred_element_type=jnp.float32) + b1_ref[...]
    h = jnp.maximum(h, 0.0)

    # fc2.  Padded lanes of b2 are -1e30 and padded columns of W2 are zero,
    # so padded-lane logits are -1e30 -> exp() underflows to 0 and they drop
    # out of the softmax with no per-step masking work.
    logits = jnp.dot(h, w2_ref[...], preferred_element_type=jnp.float32) + b2_ref[...]

    # Row-wise softmax (PyTorch dim=0 on a 1-D obs == last axis per row here).
    m = jnp.max(logits, axis=-1, keepdims=True)
    e = jnp.exp(logits - m)
    s = jnp.sum(e, axis=-1, keepdims=True)
    probs = e * pl.reciprocal(s, approx=True)   # EUP vrcp, otherwise idle slot

    out_size = out_ref.shape[-1]
    out_ref[...] = probs[:, :out_size]          # narrow (masked) store


def prepare_params(w1, b1, w2, b2):
    """Zero-pad hidden/output dims to full 128-lane groups, done once at init.

    Zero columns of W1 / zero lanes of b1 give relu(0)=0 hidden activations,
    and zero rows/columns of W2 contribute nothing.  The padded lanes of b2
    are set to -1e30 so padded-lane logits vanish from the softmax without
    any in-kernel masking.  Biases stored as (1, N) keep per-call reshapes
    out of the hot path.
    """
    in_size, hidden = w1.shape
    out_size = w2.shape[1]
    hpad = _round_up(hidden, LANE)
    opad = _round_up(out_size, LANE)
    w1p = jnp.zeros((in_size, hpad), jnp.float32).at[:, :hidden].set(w1)
    b1p = jnp.zeros((1, hpad), jnp.float32).at[0, :hidden].set(b1)
    w2p = jnp.zeros((hpad, opad), jnp.float32).at[:hidden, :out_size].set(w2)
    b2p = jnp.full((1, opad), NEG_BIG, jnp.float32).at[0, :out_size].set(b2)
    # TODO(synk): optional bf16 copies of w1p/w2p for v6e/v7x (keep f32 acc);
    # left off to preserve bit-level fidelity with the f32 reference.
    return (w1p, b1p, w2p, b2p), out_size


def policy_net_forward(x, padded_params, out_size, *, block_b=1024):
    """x: (B, input_size) or (input_size,) float32 -> action probabilities."""
    w1p, b1p, w2p, b2p = padded_params
    x = jnp.asarray(x, jnp.float32)
    squeeze = x.ndim == 1
    if squeeze:
        x = x[None, :]
    B, in_size = x.shape
    hpad = w1p.shape[1]
    opad = w2p.shape[1]

    if B <= block_b:
        # Single tile == full array: no (8,128) divisibility constraint, no
        # host-side pad, no trailing slice, one grid step.
        tile, bp = B, B
    else:
        tile = _round_up(min(block_b, B), 8)
        bp = _round_up(B, tile)
        if bp != B:
            # Padded rows are zeros -> finite logits -> no NaNs; sliced off
            # below.
            # TODO(synk): for very large ragged batches a second small call
            # on the tail would avoid this full-array XLA pad copy.
            x = jnp.pad(x, ((0, bp - B), (0, 0)))
    nb = bp // tile

    flops = 2 * bp * (in_size * hpad + hpad * opad)
    bytes_accessed = 4 * (bp * in_size + w1p.size + b1p.size + w2p.size
                          + b2p.size + bp * out_size)

    # Rough VMEM footprint (double-buffered x/out tiles at 128-lane layout,
    # f32 temporaries h/logits/e, resident weights); raise the scoped limit
    # only when a big tile needs it.  v5e defaults to 16 MiB scoped; v7x has
    # 64 MiB physical per TC, so cap the request there.
    vmem_est = 4 * tile * 7 * LANE + 4 * (w1p.size + b1p.size + w2p.size + b2p.size)
    compiler_kwargs = dict(dimension_semantics=("parallel",))
    if vmem_est > 12 * (1 << 20):
        compiler_kwargs["vmem_limit_bytes"] = int(min(64 * (1 << 20), 2 * vmem_est))

    out = pl.pallas_call(
        policy_net_kernel,
        out_shape=jax.ShapeDtypeStruct((bp, out_size), jnp.float32),
        grid=(nb,),
        in_specs=[
            # Activations: tiled along the batch axis.
            pl.BlockSpec((tile, in_size), lambda i: (i, 0)),
            # Weights/biases: constant index_map -> DMA'd once, VMEM-resident.
            pl.BlockSpec((in_size, hpad), lambda i: (0, 0)),
            pl.BlockSpec((1, hpad), lambda i: (0, 0)),
            pl.BlockSpec((hpad, opad), lambda i: (0, 0)),
            pl.BlockSpec((1, opad), lambda i: (0, 0)),
        ],
        # Narrow output: only the real action lanes are written back to HBM.
        out_specs=pl.BlockSpec((tile, out_size), lambda i: (i, 0)),
        compiler_params=pltpu.CompilerParams(**compiler_kwargs),
        cost_estimate=pl.CostEstimate(
            flops=flops,
            transcendentals=bp * opad,
            bytes_accessed=bytes_accessed,
        ),
    )(x, w1p, b1p, w2p, b2p)

    if bp != B:
        out = out[:B]
    if squeeze:
        out = out[0]
    return out


def init_policy_net_params(key, input_size, output_size, hidden_layer_size=64):
    """Deterministic init mimicking torch.nn.Linear default U[-1/sqrt(fan_in), 1/sqrt(fan_in)]."""
    k1, k2, k3, k4 = jax.random.split(key, 4)
    bound1 = 1.0 / jnp.sqrt(jnp.float32(input_size))
    bound2 = 1.0 / jnp.sqrt(jnp.float32(hidden_layer_size))
    # Stored as (in, out) — transpose of PyTorch's (out, in).
    w1 = jax.random.uniform(k1, (input_size, hidden_layer_size), jnp.float32, -bound1, bound1)
    b1 = jax.random.uniform(k2, (hidden_layer_size,), jnp.float32, -bound1, bound1)
    w2 = jax.random.uniform(k3, (hidden_layer_size, output_size), jnp.float32, -bound2, bound2)
    b2 = jax.random.uniform(k4, (output_size,), jnp.float32, -bound2, bound2)
    return w1, b1, w2, b2


if __name__ == "__main__":
    input_size = 8      # small observation vector
    hidden = 64         # module default hidden_layer_size
    output_size = 4     # discrete actions
    batch = 256         # batched rollout observations

    key = jax.random.PRNGKey(0)
    k_params, k_x = jax.random.split(key)
    w1, b1, w2, b2 = init_policy_net_params(k_params, input_size, output_size, hidden)
    padded_params, out_size = prepare_params(w1, b1, w2, b2)

    xb = jax.random.normal(k_x, (batch, input_size), jnp.float32)

    # Batched forward through the Pallas kernel (single full-batch tile).
    probs = policy_net_forward(xb, padded_params, out_size)
    probs = jax.block_until_ready(probs)

    # Pure-JAX reference of the same (unpadded) forward pass.
    h_ref = jnp.maximum(xb @ w1 + b1, 0.0)
    probs_ref = jax.nn.softmax(h_ref @ w2 + b2, axis=-1)

    assert probs.shape == (batch, output_size)
    assert jnp.allclose(probs, probs_ref, atol=2e-3, rtol=2e-3)
    assert jnp.allclose(jnp.sum(probs, axis=-1), 1.0, atol=2e-3)

    # Multi-tile path (grid of 3 with a ragged tail) using an explicit small tile.
    xb2 = jax.random.normal(jax.random.PRNGKey(1), (300, input_size), jnp.float32)
    probs2 = jax.block_until_ready(
        policy_net_forward(xb2, padded_params, out_size, block_b=128))
    ref2 = jax.nn.softmax(jnp.maximum(xb2 @ w1 + b1, 0.0) @ w2 + b2, axis=-1)
    assert probs2.shape == (300, output_size)
    assert jnp.allclose(probs2, ref2, atol=2e-3, rtol=2e-3)

    # Single-observation path (PolicyNet.forward parity: softmax over dim=0).
    p0 = jax.block_until_ready(policy_net_forward(xb[0], padded_params, out_size))
    assert p0.shape == (output_size,)
    assert jnp.allclose(p0, probs_ref[0], atol=2e-3, rtol=2e-3)

    # TODO(synk): get_action_and_logp/act (Categorical sampling + log_prob) are
    # host/JAX-level ops on the returned probabilities, not kernel work.

    print("KERNEL_OK")
</pallas_src>

<mosaic_0001>
module attributes {stable_mosaic.version = 11 : i64} {
  func.func @policy_net_kernel(%arg0: i32, %arg1: memref<256x8xf32, #tpu.memory_space<vmem>>, %arg2: memref<8x128xf32, #tpu.memory_space<vmem>>, %arg3: memref<1x128xf32, #tpu.memory_space<vmem>>, %arg4: memref<128x128xf32, #tpu.memory_space<vmem>>, %arg5: memref<1x128xf32, #tpu.memory_space<vmem>>, %arg6: memref<256x4xf32, #tpu.memory_space<vmem>>) attributes {dimension_semantics = [#tpu.dimension_semantics<parallel>], iteration_bounds = array<i64: 1>, scalar_prefetch = 0 : i64, scratch_operands = 0 : i64, tpu.core_type = #tpu.core_type<tc>, window_params = [{transform_indices = @transform_0, window_bounds = array<i64: 256, 8>}, {pipeline_mode = #tpu.pipeline_mode<synchronous>, transform_indices = @transform_1, window_bounds = array<i64: 8, 128>}, {pipeline_mode = #tpu.pipeline_mode<synchronous>, transform_indices = @transform_2, window_bounds = array<i64: 1, 128>}, {pipeline_mode = #tpu.pipeline_mode<synchronous>, transform_indices = @transform_3, window_bounds = array<i64: 128, 128>}, {pipeline_mode = #tpu.pipeline_mode<synchronous>, transform_indices = @transform_4, window_bounds = array<i64: 1, 128>}, {transform_indices = @transform_5, window_bounds = array<i64: 256, 4>}]} {
    %c0 = arith.constant 0 : index
    %c0_0 = arith.constant 0 : index
    %0 = vector.load %arg1[%c0, %c0_0] : memref<256x8xf32, #tpu.memory_space<vmem>>, vector<256x8xf32>
    %c0_1 = arith.constant 0 : index
    %c0_2 = arith.constant 0 : index
    %1 = vector.load %arg2[%c0_1, %c0_2] : memref<8x128xf32, #tpu.memory_space<vmem>>, vector<8x128xf32>
    %cst = arith.constant dense<0.000000e+00> : vector<256x128xf32>
    %2 = tpu.matmul %0, %1, %cst {dimension_numbers = #tpu.dot_dimension_numbers<[1], [0], [0], [1], [0, 0, 1, 1], [], []>} : vector<256x8xf32>, vector<8x128xf32>, vector<256x128xf32> -> vector<256x128xf32>
    %c0_3 = arith.constant 0 : index
    %c0_4 = arith.constant 0 : index
    %3 = vector.load %arg3[%c0_3, %c0_4] : memref<1x128xf32, #tpu.memory_space<vmem>>, vector<1x128xf32>
    %4 = vector.broadcast %3 : vector<1x128xf32> to vector<256x128xf32>
    %5 = arith.addf %2, %4 : vector<256x128xf32>
    %cst_5 = arith.constant 0.000000e+00 : f32
    %6 = vector.broadcast %cst_5 : f32 to vector<256x128xf32>
    %7 = arith.maximumf %5, %6 : vector<256x128xf32>
    %c0_6 = arith.constant 0 : index
    %c0_7 = arith.constant 0 : index
    %8 = vector.load %arg4[%c0_6, %c0_7] : memref<128x128xf32, #tpu.memory_space<vmem>>, vector<128x128xf32>
    %cst_8 = arith.constant dense<0.000000e+00> : vector<256x128xf32>
    %9 = tpu.matmul %7, %8, %cst_8 {dimension_numbers = #tpu.dot_dimension_numbers<[1], [0], [0], [1], [0, 0, 1, 1], [], []>} : vector<256x128xf32>, vector<128x128xf32>, vector<256x128xf32> -> vector<256x128xf32>
    %c0_9 = arith.constant 0 : index
    %c0_10 = arith.constant 0 : index
    %10 = vector.load %arg5[%c0_9, %c0_10] : memref<1x128xf32, #tpu.memory_space<vmem>>, vector<1x128xf32>
    %11 = vector.broadcast %10 : vector<1x128xf32> to vector<256x128xf32>
    %12 = arith.addf %9, %11 : vector<256x128xf32>
    %cst_11 = arith.constant dense<0xFF800000> : vector<256xf32>
    %13 = vector.multi_reduction <maximumf>, %12, %cst_11 [1] : vector<256x128xf32> to vector<256xf32>
    %14 = vector.shape_cast %13 : vector<256xf32> to vector<256x1xf32>
    %15 = vector.broadcast %14 : vector<256x1xf32> to vector<256x128xf32>
    %16 = arith.subf %12, %15 : vector<256x128xf32>
    %17 = math.exp %16 : vector<256x128xf32>
    %cst_12 = arith.constant dense<0.000000e+00> : vector<256xf32>
    %18 = vector.multi_reduction <add>, %17, %cst_12 [1] : vector<256x128xf32> to vector<256xf32>
    %19 = vector.shape_cast %18 : vector<256xf32> to vector<256x1xf32>
    %20 = tpu.reciprocal %19 {approx = true} : vector<256x1xf32> -> vector<256x1xf32>
    %21 = vector.broadcast %20 : vector<256x1xf32> to vector<256x128xf32>
    %22 = arith.mulf %17, %21 : vector<256x128xf32>
    %23 = vector.extract_strided_slice %22 {offsets = [0, 0], sizes = [256, 4], strides = [1, 1]} : vector<256x128xf32> to vector<256x4xf32>
    %c0_13 = arith.constant 0 : index
    %c0_14 = arith.constant 0 : index
    %24 = vector.load %arg6[%c0_13, %c0_14] : memref<256x4xf32, #tpu.memory_space<vmem>>, vector<256x4xf32>
    tpu.vector_store %arg6[%c0_13, %c0_14], %23 {strides = array<i32>} : memref<256x4xf32, #tpu.memory_space<vmem>>, vector<256x4xf32>,
    return
  }
  func.func @transform_0(%arg0: i32) -> (i32, i32) {
    %c0_i32 = arith.constant 0 : i32
    %c0_i32_0 = arith.constant 0 : i32
    return %arg0, %c0_i32 : i32, i32
  }
  func.func @transform_1(%arg0: i32) -> (i32, i32) {
    %c0_i32 = arith.constant 0 : i32
    %c0_i32_0 = arith.constant 0 : i32
    %c0_i32_1 = arith.constant 0 : i32
    return %c0_i32, %c0_i32_0 : i32, i32
  }
  func.func @transform_2(%arg0: i32) -> (i32, i32) {
    %c0_i32 = arith.constant 0 : i32
    %c0_i32_0 = arith.constant 0 : i32
    %c0_i32_1 = arith.constant 0 : i32
    return %c0_i32, %c0_i32_0 : i32, i32
  }
  func.func @transform_3(%arg0: i32) -> (i32, i32) {
    %c0_i32 = arith.constant 0 : i32
    %c0_i32_0 = arith.constant 0 : i32
    %c0_i32_1 = arith.constant 0 : i32
    return %c0_i32, %c0_i32_0 : i32, i32
  }
  func.func @transform_4(%arg0: i32) -> (i32, i32) {
    %c0_i32 = arith.constant 0 : i32
    %c0_i32_0 = arith.constant 0 : i32
    %c0_i32_1 = arith.constant 0 : i32
    return %c0_i32, %c0_i32_0 : i32, i32
  }
  func.func @transform_5(%arg0: i32) -> (i32, i32) {
    %c0_i32 = arith.constant 0 : i32
    %c0_i32_0 = arith.constant 0 : i32
    return %arg0, %c0_i32 : i32, i32
  }
}

</mosaic_0001>

<bundles_post_ra>
// kernel: tpu_custom_call.1
= control target key start
LH: loop header
LB: loop body
LE: loop exit
PB: predicated region body
PF: predicated region fallthrough
CT: control target
= control target key end

     0   :  { %vm60_vm0 = vcmask 64512   ;;  %vm950_vm1 = vcmask 31744   ;;  %s2075_s1 = inlined_call_operand.vmem [shape: f32[8,128], index: 1, kind: input, shape index: {}]   ;;  %s2076_s0 = inlined_call_operand.vmem [shape: f32[256,8], index: 0, kind: input, shape index: {}]   ;;  %s2077_s3 = inlined_call_operand.vmem [shape: f32[128,128], index: 3, kind: input, shape index: {}]   ;;  %s2078_s2 = inlined_call_operand.vmem [shape: f32[1,128], index: 2, kind: input, shape index: {}]   ;;  %s2079_s4 = inlined_call_operand.vmem [shape: f32[1,128], index: 4, kind: input, shape index: {}]   ;;  %s2080_s5 = inlined_call_operand.vmem [shape: f32[256,4], index: 5, kind: output, shape index: {}]  }
   0x1   :  { %v52_v0 = vld [vmem:[%s2075_s1] sm:$0xff]  ;;  %v21_v2 = vld [vmem:[%s2076_s0 + $0x8] sm:$0xff]  ;;  %v22_v3 = vld [vmem:[%s2076_s0 + $0x10] sm:$0xff] }
   0x2   :  { %v20_v1 = vld [vmem:[%s2076_s0] sm:$0xff]  ;;  %1102 = vmatprep.subr.mxu0 %v52_v0  ;;  %v23_v4 = vld [vmem:[%s2076_s0 + $0x18] sm:$0xff]  ;;  %v25_v6 = vld [vmem:[%s2076_s0 + $0x28] sm:$0xff] }
   0x3   :  { %1104 = vmatprep.mubr.msk.f32.mxu0 %vm60_vm0, %v20_v1  ;;  %1103 = vmatpush3.msra.mxu0 %v52_v0  ;;  %v24_v5 = vld [vmem:[%s2076_s0 + $0x20] sm:$0xff]  ;;  %v26_v7 = vld [vmem:[%s2076_s0 + $0x30] sm:$0xff]  ;;  %v415_v9 = vld [vmem:[%s2077_s3 + $0x8] sm:$0xff] }
   0x4   :  { %1105 = vmatmul.mubr.msk.f32.vlgmr.msra.gmra.mrb[0].mxu0 %vm60_vm0, %v21_v2  ;;  %v414_v8 = vld [vmem:[%s2077_s3] sm:$0xff]  ;;  %v416_v10 = vld [vmem:[%s2077_s3 + $0x10] sm:$0xff]  ;;  %v27_v11 = vld [vmem:[%s2076_s0 + $0x38] sm:$0xff] }
   0x5   :  { %1107 = vmatprep.mubr.msk.f32.mxu0 %vm60_vm0, %v22_v3  ;;  %v1232_v12 = vpack.c.bf16 %v415_v9, %v414_v8  ;;  %v417_v13 = vld [vmem:[%s2077_s3 + $0x18] sm:$0xff]  ;;  %v28_v14 = vld [vmem:[%s2076_s0 + $0x40] sm:$0xff]  ;;  %v419_v17 = vld [vmem:[%s2077_s3 + $0x28] sm:$0xff] }
   0x6   :  { %v1236_v15 = vpack.c.bf16 %v417_v13, %v416_v10  ;;  %v418_v16 = vld [vmem:[%s2077_s3 + $0x20] sm:$0xff]  ;;  %v29_v18 = vld [vmem:[%s2076_s0 + $0x48] sm:$0xff]  ;;  %v30_v19 = vld [vmem:[%s2076_s0 + $0x50] sm:$0xff] }
   0x7   :  { %1233 = vmatprep.subr.bf16.mxu0 %v1232_v12  ;;  %1264 = vmatprep.subr.bf16.mxu1 %v1232_v12  ;;  %v1240_v20 = vpack.c.bf16 %v419_v17, %v418_v16  ;;  %v420_v21 = vld [vmem:[%s2077_s3 + $0x30] sm:$0xff]  ;;  %v421_v22 = vld [vmem:[%s2077_s3 + $0x38] sm:$0xff]  ;;  %v32_v24 = vld [vmem:[%s2076_s0 + $0x60] sm:$0xff] }
   0x8   :  { %1108 = vmatmul.mubr.msk.f32.gmra.mrb[2].mxu0 %vm60_vm0, %v23_v4  ;;  %1272 = vmatpush3.bf16.msra.mxu1 %v1232_v12  ;;  %v31_v23 = vld [vmem:[%s2076_s0 + $0x58] sm:$0xff]  ;;  %v1244_v25 = vpack.c.bf16 %v421_v22, %v420_v21  ;;  %v422_v26 = vld [vmem:[%s2077_s3 + $0x40] sm:$0xff]  ;;  %v423_v27 = vld [vmem:[%s2077_s3 + $0x48] sm:$0xff] }
   0x9   :  { %1110 = vmatprep.mubr.msk.f32.mxu0 %vm60_vm0, %v24_v5  ;;  %1235 = vmatpush3.bf16.msra.mxu0 %v1232_v12  ;;  %v33_v28 = vld [vmem:[%s2076_s0 + $0x68] sm:$0xff]  ;;  %v34_v29 = vld [vmem:[%s2076_s0 + $0x70] sm:$0xff]  ;;  %v1248_v30 = vpack.c.bf16 %v423_v27, %v422_v26  ;;  %v425_v32 = vld [vmem:[%s2077_s3 + $0x58] sm:$0xff] }
   0xa   :  { %1237 = vmatprep.subr.bf16.mxu0 %v1236_v15  ;;  %1265 = vmatprep.subr.bf16.mxu1 %v1236_v15  ;;  %v424_v31 = vld [vmem:[%s2077_s3 + $0x50] sm:$0xff]  ;;  %v35_v33 = vld [vmem:[%s2076_s0 + $0x78] sm:$0xff]  ;;  %v36_v34 = vld [vmem:[%s2076_s0 + $0x80] sm:$0xff] }
   0xb   :  { %v1252_v35 = vpack.c.bf16 %v425_v32, %v424_v31  ;;  %v426_v36 = vld [vmem:[%s2077_s3 + $0x60] sm:$0xff]  ;;  %v427_v37 = vld [vmem:[%s2077_s3 + $0x68] sm:$0xff]  ;;  %v38_v39 = vld [vmem:[%s2076_s0 + $0x90] sm:$0xff] }
   0xc   :  { %1111 = vmatmul.mubr.msk.f32.gmra.mrb[4].mxu0 %vm60_vm0, %v25_v6  ;;  %1273 = vmatpush3.bf16.msra.mxu1 %v1236_v15  ;;  %v37_v38 = vld [vmem:[%s2076_s0 + $0x88] sm:$0xff]  ;;  %v1256_v40 = vpack.c.bf16 %v427_v37, %v426_v36  ;;  %v428_v41 = vld [vmem:[%s2077_s3 + $0x70] sm:$0xff]  ;;  %v429_v42 = vld [vmem:[%s2077_s3 + $0x78] sm:$0xff] }
   0xd   :  { %1113 = vmatprep.mubr.msk.f32.mxu0 %vm60_vm0, %v26_v7  ;;  %1239 = vmatpush3.bf16.msra.mxu0 %v1236_v15  ;;  %v39_v43 = vld [vmem:[%s2076_s0 + $0x98] sm:$0xff]  ;;  %v40_v44 = vld [vmem:[%s2076_s0 + $0xa0] sm:$0xff]  ;;  %v1260_v45 = vpack.c.bf16 %v429_v42, %v428_v41  ;;  %v41_v46 = vld [vmem:[%s2076_s0 + $0xa8] sm:$0xff] }
   0xe   :  { %1241 = vmatprep.subr.bf16.mxu0 %v1240_v20  ;;  %1266 = vmatprep.subr.bf16.mxu1 %v1240_v20  ;;  %v42_v47 = vld [vmem:[%s2076_s0 + $0xb0] sm:$0xff]  ;;  %v43_v48 = vld [vmem:[%s2076_s0 + $0xb8] sm:$0xff]  ;;  %v44_v49 = vld [vmem:[%s2076_s0 + $0xc0] sm:$0xff] }
   0xf   :  { %v45_v50 = vld [vmem:[%s2076_s0 + $0xc8] sm:$0xff]  ;;  %v46_v51 = vld [vmem:[%s2076_s0 + $0xd0] sm:$0xff]  ;;  %v47_v52 = vld [vmem:[%s2076_s0 + $0xd8] sm:$0xff] }
  0x10   :  { %1114 = vmatmul.mubr.msk.f32.gmra.mrb[6].mxu0 %vm60_vm0, %v27_v11  ;;  %1274 = vmatpush3.bf16.msra.mxu1 %v1240_v20  ;;  %v48_v53 = vld [vmem:[%s2076_s0 + $0xe0] sm:$0xff]  ;;  %v49_v54 = vld [vmem:[%s2076_s0 + $0xe8] sm:$0xff]  ;;  %v50_v55 = vld [vmem:[%s2076_s0 + $0xf0] sm:$0xff] }
  0x11   :  { %1116 = vmatprep.mubr.msk.f32.mxu0 %vm60_vm0, %v28_v14  ;;  %1243 = vmatpush3.bf16.msra.mxu0 %v1240_v20  ;;  %v51_v56 = vld [vmem:[%s2076_s0 + $0xf8] sm:$0xff]  ;;  %v1620_v57 = vld [vmem:[%s2078_s2] ss:$0 sm:$0xff] }
  0x12   :  { %1245 = vmatprep.subr.bf16.mxu0 %v1244_v25  ;;  %1267 = vmatprep.subr.bf16.mxu1 %v1244_v25 }
  0x14   :  { %1117 = vmatmul.mubr.msk.f32.gmra.mrb[8].mxu0 %vm60_vm0, %v29_v18  ;;  %1275 = vmatpush3.bf16.msra.mxu1 %v1244_v25 }
  0x15   :  { %1119 = vmatprep.mubr.msk.f32.mxu0 %vm60_vm0, %v30_v19  ;;  %1247 = vmatpush3.bf16.msra.mxu0 %v1244_v25 }
  0x16   :  { %1249 = vmatprep.subr.bf16.mxu0 %v1248_v30  ;;  %1268 = vmatprep.subr.bf16.mxu1 %v1248_v30 }
  0x18   :  { %1120 = vmatmul.mubr.msk.f32.gmra.mrb[10].mxu0 %vm60_vm0, %v31_v23  ;;  %1276 = vmatpush3.bf16.msra.mxu1 %v1248_v30 }
  0x19   :  { %1122 = vmatprep.mubr.msk.f32.mxu0 %vm60_vm0, %v32_v24  ;;  %1251 = vmatpush3.bf16.msra.mxu0 %v1248_v30 }
  0x1a   :  { %1253 = vmatprep.subr.bf16.mxu0 %v1252_v35  ;;  %1269 = vmatprep.subr.bf16.mxu1 %v1252_v35 }
  0x1c   :  { %1123 = vmatmul.mubr.msk.f32.gmra.mrb[12].mxu0 %vm60_vm0, %v33_v28  ;;  %1277 = vmatpush3.bf16.msra.mxu1 %v1252_v35 }
  0x1d   :  { %1125 = vmatprep.mubr.msk.f32.mxu0 %vm60_vm0, %v34_v29  ;;  %1255 = vmatpush3.bf16.msra.mxu0 %v1252_v35 }
  0x1e   :  { %1257 = vmatprep.subr.bf16.mxu0 %v1256_v40  ;;  %1270 = vmatprep.subr.bf16.mxu1 %v1256_v40 }
  0x20   :  { %1126 = vmatmul.mubr.msk.f32.gmra.mrb[14].mxu0 %vm60_vm0, %v35_v33  ;;  %1278 = vmatpush3.bf16.msra.mxu1 %v1256_v40 }
  0x21   :  { %1128 = vmatprep.mubr.msk.f32.mxu0 %vm60_vm0, %v36_v34  ;;  %1259 = vmatpush3.bf16.msra.mxu0 %v1256_v40 }
  0x22   :  { %1261 = vmatprep.subr.bf16.mxu0 %v1260_v45  ;;  %1271 = vmatprep.subr.bf16.mxu1 %v1260_v45 }
  0x24   :  { %1129 = vmatmul.mubr.msk.f32.gmra.mrb[16].mxu0 %vm60_vm0, %v37_v38  ;;  %1279 = vmatpush3.bf16.msra.mxu1 %v1260_v45 }
  0x25   :  { %1131 = vmatprep.mubr.msk.f32.mxu0 %vm60_vm0, %v38_v39  ;;  %1263 = vmatpush3.bf16.msra.mxu0 %v1260_v45 }
  0x28   :  { %1132 = vmatmul.mubr.msk.f32.gmra.mrb[18].mxu0 %vm60_vm0, %v39_v43 }
  0x29   :  { %1134 = vmatprep.mubr.msk.f32.mxu0 %vm60_vm0, %v40_v44 }
  0x2c   :  { %1135 = vmatmul.mubr.msk.f32.gmra.mrb[20].mxu0 %vm60_vm0, %v41_v46 }
  0x2d   :  { %1137 = vmatprep.mubr.msk.f32.mxu0 %vm60_vm0, %v42_v47 }
  0x30   :  { %1138 = vmatmul.mubr.msk.f32.gmra.mrb[22].mxu0 %vm60_vm0, %v43_v48 }
  0x31   :  { %1140 = vmatprep.mubr.msk.f32.mxu0 %vm60_vm0, %v44_v49 }
  0x34   :  { %1141 = vmatmul.mubr.msk.f32.gmra.mrb[24].mxu0 %vm60_vm0, %v45_v50 }
  0x35   :  { %1143 = vmatprep.mubr.msk.f32.mxu0 %vm60_vm0, %v46_v51 }
  0x38   :  { %1144 = vmatmul.mubr.msk.f32.gmra.mrb[26].mxu0 %vm60_vm0, %v47_v52 }
  0x39   :  { %1146 = vmatprep.mubr.msk.f32.mxu0 %vm60_vm0, %v48_v53 }
  0x3c   :  { %1147 = vmatmul.mubr.msk.f32.gmra.mrb[28].mxu0 %vm60_vm0, %v49_v54 }
  0x3d   :  { %1149 = vmatprep.mubr.msk.f32.mxu0 %vm60_vm0, %v50_v55 }
  0x40   :  { %1150 = vmatmul.mubr.msk.f32.gmra.mrb[30].mxu0 %vm60_vm0, %v51_v56 }
  0xd7   :  { %v1106_v58 = vpop.f32.mrb[0].mxu0 }
  0xd8   :  { %v229_v59 = vadd.f32 %v1106_v58, %v1620_v57  ;;  %v223_v60 = vpop.f32.mrb[1].mxu0 }
  0xd9   :  { %v224_v61 = vadd.f32 %v1620_v57, %v223_v60 }
  0xda   :  { %v383_v0 = vmax.f32 %v229_v59, 0.0 }
  0xdb   :  { %v382_v62 = vmax.f32 %v224_v61, 0.0  ;;  %v1109_v63 = vpop.f32.mrb[2].mxu0 }
  0xdc   :  { %v239_v1 = vadd.f32 %v1109_v63, %v1620_v57  ;;  %v233_v2 = vpop.f32.mrb[3].mxu0 }
  0xdd   :  { %v234_v3 = vadd.f32 %v1620_v57, %v233_v2  ;;  %1184 = vmatprep.mubr.f32.mxu0 %v382_v62 }
  0xde   :  { %1185 = vmatmul.mubr.f32.vlgmr.msra.gmra.mrb[32].mxu0 %v383_v0  ;;  %v385_v6 = vmax.f32 %v239_v1, 0.0 }
  0xdf   :  { %v384_v4 = vmax.f32 %v234_v3, 0.0  ;;  %v1112_v5 = vpop.f32.mrb[4].mxu0 }
  0xe0   :  { %v249_v7 = vadd.f32 %v1112_v5, %v1620_v57  ;;  %v243_v8 = vpop.f32.mrb[5].mxu0 }
  0xe1   :  { %v244_v9 = vadd.f32 %v1620_v57, %v243_v8  ;;  %1187 = vmatprep.mubr.f32.mxu0 %v384_v4 }
  0xe2   :  { %v387_v10 = vmax.f32 %v249_v7, 0.0  ;;  %1188 = vmatmul.mubr.f32.gmra.mrb[34].mxu0 %v385_v6 }
  0xe3   :  { %v386_v11 = vmax.f32 %v244_v9, 0.0  ;;  %v1115_v12 = vpop.f32.mrb[6].mxu0 }
  0xe4   :  { %v259_v13 = vadd.f32 %v1115_v12, %v1620_v57  ;;  %v253_v14 = vpop.f32.mrb[7].mxu0 }
  0xe5   :  { %1190 = vmatprep.mubr.f32.mxu0 %v386_v11  ;;  %v254_v15 = vadd.f32 %v1620_v57, %v253_v14 }
  0xe6   :  { %v389_v16 = vmax.f32 %v259_v13, 0.0  ;;  %1191 = vmatmul.mubr.f32.gmra.mrb[36].mxu0 %v387_v10 }
  0xe7   :  { %v1118_v17 = vpop.f32.mrb[8].mxu0  ;;  %v388_v18 = vmax.f32 %v254_v15, 0.0 }
  0xe8   :  { %v269_v19 = vadd.f32 %v1118_v17, %v1620_v57  ;;  %v263_v20 = vpop.f32.mrb[9].mxu0 }
  0xe9   :  { %v264_v21 = vadd.f32 %v1620_v57, %v263_v20  ;;  %1193 = vmatprep.mubr.f32.mxu1 %v388_v18 }
  0xea   :  { %v391_v22 = vmax.f32 %v269_v19, 0.0  ;;  %1194 = vmatmul.mubr.f32.vlgmr.msra.gmra.mrb[0].mxu1 %v389_v16 }
  0xeb   :  { %v390_v23 = vmax.f32 %v264_v21, 0.0  ;;  %v1121_v24 = vpop.f32.mrb[10].mxu0 }
  0xec   :  { %v279_v25 = vadd.f32 %v1121_v24, %v1620_v57  ;;  %v273_v26 = vpop.f32.mrb[11].mxu0 }
  0xed   :  { %v274_v27 = vadd.f32 %v1620_v57, %v273_v26  ;;  %1196 = vmatprep.mubr.f32.mxu1 %v390_v23 }
  0xee   :  { %v393_v28 = vmax.f32 %v279_v25, 0.0  ;;  %1197 = vmatmul.mubr.f32.gmra.mrb[2].mxu1 %v391_v22 }
  0xef   :  { %v392_v29 = vmax.f32 %v274_v27, 0.0  ;;  %v1124_v30 = vpop.f32.mrb[12].mxu0  ;;  %v1657_v27 = vld [vmem:[%s2079_s4] ss:$0 sm:$0xff] }
  0xf0   :  { %v289_v31 = vadd.f32 %v1124_v30, %v1620_v57  ;;  %v283_v32 = vpop.f32.mrb[13].mxu0 }
  0xf1   :  { %v284_v33 = vadd.f32 %v1620_v57, %v283_v32  ;;  %1199 = vmatprep.mubr.f32.mxu1 %v392_v29 }
  0xf2   :  { %v395_v34 = vmax.f32 %v289_v31, 0.0  ;;  %1200 = vmatmul.mubr.f32.gmra.mrb[4].mxu1 %v393_v28 }
  0xf3   :  { %v394_v35 = vmax.f32 %v284_v33, 0.0  ;;  %v1127_v36 = vpop.f32.mrb[14].mxu0 }
  0xf4   :  { %v299_v37 = vadd.f32 %v1127_v36, %v1620_v57  ;;  %v293_v38 = vpop.f32.mrb[15].mxu0 }
  0xf5   :  { %v294_v39 = vadd.f32 %v1620_v57, %v293_v38  ;;  %1202 = vmatprep.mubr.f32.mxu1 %v394_v35 }
  0xf6   :  { %v397_v40 = vmax.f32 %v299_v37, 0.0  ;;  %1203 = vmatmul.mubr.f32.gmra.mrb[6].mxu1 %v395_v34 }
  0xf7   :  { %v396_v41 = vmax.f32 %v294_v39, 0.0  ;;  %v1130_v42 = vpop.f32.mrb[16].mxu0 }
  0xf8   :  { %v309_v43 = vadd.f32 %v1130_v42, %v1620_v57  ;;  %v303_v44 = vpop.f32.mrb[17].mxu0 }
  0xf9   :  { %v304_v45 = vadd.f32 %v1620_v57, %v303_v44  ;;  %1205 = vmatprep.mubr.f32.mxu1 %v396_v41 }
  0xfa   :  { %v399_v46 = vmax.f32 %v309_v43, 0.0  ;;  %1206 = vmatmul.mubr.f32.gmra.mrb[8].mxu1 %v397_v40 }
  0xfb   :  { %v398_v47 = vmax.f32 %v304_v45, 0.0  ;;  %v1133_v48 = vpop.f32.mrb[18].mxu0 }
  0xfc   :  { %v319_v49 = vadd.f32 %v1133_v48, %v1620_v57  ;;  %v313_v50 = vpop.f32.mrb[19].mxu0 }
  0xfd   :  { %v314_v51 = vadd.f32 %v1620_v57, %v313_v50  ;;  %1208 = vmatprep.mubr.f32.mxu1 %v398_v47 }
  0xfe   :  { %v401_v52 = vmax.f32 %v319_v49, 0.0  ;;  %1209 = vmatmul.mubr.f32.gmra.mrb[10].mxu1 %v399_v46 }
  0xff   :  { %v400_v53 = vmax.f32 %v314_v51, 0.0  ;;  %v1136_v54 = vpop.f32.mrb[20].mxu0 }
 0x100   :  { %v329_v55 = vadd.f32 %v1136_v54, %v1620_v57  ;;  %v323_v56 = vpop.f32.mrb[21].mxu0 }
 0x101   :  { %v324_v58 = vadd.f32 %v1620_v57, %v323_v56  ;;  %1211 = vmatprep.mubr.f32.mxu1 %v400_v53 }
 0x102   :  { %v403_v59 = vmax.f32 %v329_v55, 0.0  ;;  %1212 = vmatmul.mubr.f32.gmra.mrb[12].mxu1 %v401_v52 }
 0x103   :  { %v402_v60 = vmax.f32 %v324_v58, 0.0  ;;  %v1139_v61 = vpop.f32.mrb[22].mxu0 }
 0x104   :  { %v339_v62 = vadd.f32 %v1139_v61, %v1620_v57  ;;  %v333_v63 = vpop.f32.mrb[23].mxu0 }
 0x105   :  { %v334_v0 = vadd.f32 %v1620_v57, %v333_v63  ;;  %1214 = vmatprep.mubr.f32.mxu1 %v402_v60 }
 0x106   :  { %v405_v1 = vmax.f32 %v339_v62, 0.0  ;;  %1215 = vmatmul.mubr.f32.gmra.mrb[14].mxu1 %v403_v59 }
 0x107   :  { %v404_v2 = vmax.f32 %v334_v0, 0.0  ;;  %v1142_v3 = vpop.f32.mrb[24].mxu0 }
 0x108   :  { %v349_v4 = vadd.f32 %v1142_v3, %v1620_v57  ;;  %v343_v5 = vpop.f32.mrb[25].mxu0 }
 0x109   :  { %v344_v6 = vadd.f32 %v1620_v57, %v343_v5  ;;  %1217 = vmatprep.mubr.f32.mxu1 %v404_v2 }
 0x10a   :  { %v407_v7 = vmax.f32 %v349_v4, 0.0  ;;  %1218 = vmatmul.mubr.f32.gmra.mrb[16].mxu1 %v405_v1 }
 0x10b   :  { %v406_v8 = vmax.f32 %v344_v6, 0.0  ;;  %v1145_v9 = vpop.f32.mrb[26].mxu0 }
 0x10c   :  { %v359_v10 = vadd.f32 %v1145_v9, %v1620_v57  ;;  %v353_v11 = vpop.f32.mrb[27].mxu0 }
 0x10d   :  { %v354_v12 = vadd.f32 %v1620_v57, %v353_v11  ;;  %1220 = vmatprep.mubr.f32.mxu1 %v406_v8 }
 0x10e   :  { %v409_v13 = vmax.f32 %v359_v10, 0.0  ;;  %1221 = vmatmul.mubr.f32.gmra.mrb[18].mxu1 %v407_v7 }
 0x10f   :  { %v408_v14 = vmax.f32 %v354_v12, 0.0  ;;  %v1148_v15 = vpop.f32.mrb[28].mxu0 }
 0x110   :  { %v369_v16 = vadd.f32 %v1148_v15, %v1620_v57  ;;  %v363_v17 = vpop.f32.mrb[29].mxu0 }
 0x111   :  { %v364_v18 = vadd.f32 %v1620_v57, %v363_v17  ;;  %1223 = vmatprep.mubr.f32.mxu1 %v408_v14 }
 0x112   :  { %v411_v19 = vmax.f32 %v369_v16, 0.0  ;;  %1224 = vmatmul.mubr.f32.gmra.mrb[20].mxu1 %v409_v13 }
 0x113   :  { %v410_v20 = vmax.f32 %v364_v18, 0.0  ;;  %v1151_v21 = vpop.f32.mrb[30].mxu0 }
 0x114   :  { %v379_v22 = vadd.f32 %v1151_v21, %v1620_v57  ;;  %v373_v23 = vpop.f32.mrb[31].mxu0 }
 0x115   :  { %v374_v24 = vadd.f32 %v1620_v57, %v373_v23  ;;  %1226 = vmatprep.mubr.f32.mxu1 %v410_v20 }
 0x116   :  { %v413_v25 = vmax.f32 %v379_v22, 0.0  ;;  %1227 = vmatmul.mubr.f32.gmra.mrb[22].mxu1 %v411_v19 }
 0x117   :  { %v412_v26 = vmax.f32 %v374_v24, 0.0 }
 0x119   :  { %1229 = vmatprep.mubr.f32.mxu1 %v412_v26 }
 0x11a   :  { %1230 = vmatmul.mubr.f32.gmra.mrb[24].mxu1 %v413_v25 }
 0x1b1   :  { %v1186_v28 = vpop.f32.mrb[32].mxu0 }
 0x1b2   :  { %v1660_v29 = vadd.f32 %v1186_v28, %v1657_v27  ;;  %v503_v30 = vpop.f32.mrb[33].mxu0 }
 0x1b3   :  { %v1664_v57 = vadd.f32 %v1657_v27, %v503_v30 }
 0x1b4   :  { %664 = vmax.xlane.f32.xlu0 %v1660_v29 }
 0x1b5   :  { %v1189_v31 = vpop.f32.mrb[34].mxu0 }
 0x1b6   :  { %v1667_v32 = vadd.f32 %v1189_v31, %v1657_v27  ;;  %v513_v33 = vpop.f32.mrb[35].mxu0 }
 0x1b7   :  { %v1672_v35 = vadd.f32 %v1657_v27, %v513_v33 }
 0x1b8   :  { %668 = vmax.xlane.f32.xlu1 %v1667_v32  ;;  %662 = vmax.xlane.f32.xlu0 %v1664_v57 }
 0x1b9   :  { %v1192_v34 = vpop.f32.mrb[36].mxu0 }
 0x1ba   :  { %v523_v36 = vpop.f32.mrb[37].mxu0  ;;  %v1680_v39 = vadd.f32 %v1192_v34, %v1657_v27 }
 0x1bb   :  { %v1675_v37 = vadd.f32 %v1657_v27, %v523_v36 }
 0x1bc   :  { %666 = vmax.xlane.f32.xlu1 %v1672_v35 }
 0x1bd   :  { %v1195_v38 = vpop.f32.mrb[0].mxu1  ;;  %670 = vmax.xlane.f32.xlu0 %v1675_v37 }
 0x1be   :  { %v533_v40 = vpop.f32.mrb[1].mxu1  ;;  %v1688_v43 = vadd.f32 %v1195_v38, %v1657_v27 }
 0x1bf   :  { %v1683_v41 = vadd.f32 %v1657_v27, %v533_v40 }
 0x1c0   :  { %672 = vmax.xlane.f32.xlu1 %v1680_v39 }
 0x1c1   :  { %v1198_v42 = vpop.f32.mrb[2].mxu1  ;;  %674 = vmax.xlane.f32.xlu0 %v1683_v41 }
 0x1c2   :  { %v543_v44 = vpop.f32.mrb[3].mxu1  ;;  %v1696_v47 = vadd.f32 %v1198_v42, %v1657_v27 }
 0x1c3   :  { %v1691_v45 = vadd.f32 %v1657_v27, %v543_v44 }
 0x1c4   :  { %676 = vmax.xlane.f32.xlu1 %v1688_v43 }
 0x1c5   :  { %v1201_v46 = vpop.f32.mrb[4].mxu1  ;;  %678 = vmax.xlane.f32.xlu0 %v1691_v45 }
 0x1c6   :  { %v553_v48 = vpop.f32.mrb[5].mxu1  ;;  %v1704_v51 = vadd.f32 %v1201_v46, %v1657_v27 }
 0x1c7   :  { %v1699_v49 = vadd.f32 %v1657_v27, %v553_v48 }
 0x1c8   :  { %680 = vmax.xlane.f32.xlu1 %v1696_v47 }
 0x1c9   :  { %v1204_v50 = vpop.f32.mrb[6].mxu1  ;;  %682 = vmax.xlane.f32.xlu0 %v1699_v49 }
 0x1ca   :  { %v563_v52 = vpop.f32.mrb[7].mxu1  ;;  %v1712_v55 = vadd.f32 %v1204_v50, %v1657_v27 }
 0x1cb   :  { %v1707_v53 = vadd.f32 %v1657_v27, %v563_v52 }
 0x1cc   :  { %684 = vmax.xlane.f32.xlu1 %v1704_v51 }
 0x1cd   :  { %v1207_v54 = vpop.f32.mrb[8].mxu1  ;;  %686 = vmax.xlane.f32.xlu0 %v1707_v53 }
 0x1ce   :  { %v573_v56 = vpop.f32.mrb[9].mxu1  ;;  %v1720_v60 = vadd.f32 %v1207_v54, %v1657_v27 }
 0x1cf   :  { %v1715_v58 = vadd.f32 %v1657_v27, %v573_v56 }
 0x1d0   :  { %688 = vmax.xlane.f32.xlu1 %v1712_v55 }
 0x1d1   :  { %v1210_v59 = vpop.f32.mrb[10].mxu1  ;;  %690 = vmax.xlane.f32.xlu0 %v1715_v58 }
 0x1d2   :  { %v583_v61 = vpop.f32.mrb[11].mxu1  ;;  %v1728_v0 = vadd.f32 %v1210_v59, %v1657_v27 }
 0x1d3   :  { %v1723_v62 = vadd.f32 %v1657_v27, %v583_v61 }
 0x1d4   :  { %692 = vmax.xlane.f32.xlu1 %v1720_v60 }
 0x1d5   :  { %v1213_v63 = vpop.f32.mrb[12].mxu1  ;;  %694 = vmax.xlane.f32.xlu0 %v1723_v62 }
 0x1d6   :  { %v593_v1 = vpop.f32.mrb[13].mxu1  ;;  %v1736_v4 = vadd.f32 %v1213_v63, %v1657_v27 }
 0x1d7   :  { %v1731_v2 = vadd.f32 %v1657_v27, %v593_v1 }
 0x1d8   :  { %696 = vmax.xlane.f32.xlu1 %v1728_v0 }
 0x1d9   :  { %v1216_v3 = vpop.f32.mrb[14].mxu1  ;;  %698 = vmax.xlane.f32.xlu0 %v1731_v2 }
 0x1da   :  { %v603_v5 = vpop.f32.mrb[15].mxu1  ;;  %v1744_v8 = vadd.f32 %v1216_v3, %v1657_v27 }
 0x1db   :  { %v1739_v6 = vadd.f32 %v1657_v27, %v603_v5 }
 0x1dc   :  { %700 = vmax.xlane.f32.xlu1 %v1736_v4 }
 0x1dd   :  { %v1219_v7 = vpop.f32.mrb[16].mxu1  ;;  %702 = vmax.xlane.f32.xlu0 %v1739_v6 }
 0x1de   :  { %v613_v9 = vpop.f32.mrb[17].mxu1  ;;  %v1752_v12 = vadd.f32 %v1219_v7, %v1657_v27 }
 0x1df   :  { %v1747_v10 = vadd.f32 %v1657_v27, %v613_v9 }
 0x1e0   :  { %704 = vmax.xlane.f32.xlu1 %v1744_v8 }
 0x1e1   :  { %v1222_v11 = vpop.f32.mrb[18].mxu1  ;;  %706 = vmax.xlane.f32.xlu0 %v1747_v10 }
 0x1e2   :  { %v623_v13 = vpop.f32.mrb[19].mxu1  ;;  %v1760_v16 = vadd.f32 %v1222_v11, %v1657_v27 }
 0x1e3   :  { %v1755_v14 = vadd.f32 %v1657_v27, %v623_v13 }
 0x1e4   :  { %708 = vmax.xlane.f32.xlu1 %v1752_v12 }
 0x1e5   :  { %v1225_v15 = vpop.f32.mrb[20].mxu1  ;;  %710 = vmax.xlane.f32.xlu0 %v1755_v14 }
 0x1e6   :  { %v633_v17 = vpop.f32.mrb[21].mxu1  ;;  %v1768_v20 = vadd.f32 %v1225_v15, %v1657_v27 }
 0x1e7   :  { %v1763_v18 = vadd.f32 %v1657_v27, %v633_v17 }
 0x1e8   :  { %712 = vmax.xlane.f32.xlu1 %v1760_v16 }
 0x1e9   :  { %v1228_v19 = vpop.f32.mrb[22].mxu1  ;;  %714 = vmax.xlane.f32.xlu0 %v1763_v18 }
 0x1ea   :  { %v643_v21 = vpop.f32.mrb[23].mxu1  ;;  %v1776_v24 = vadd.f32 %v1228_v19, %v1657_v27 }
 0x1eb   :  { %v1771_v22 = vadd.f32 %v1657_v27, %v643_v21 }
 0x1ec   :  { %716 = vmax.xlane.f32.xlu1 %v1768_v20 }
 0x1ed   :  { %v1231_v23 = vpop.f32.mrb[24].mxu1  ;;  %718 = vmax.xlane.f32.xlu0 %v1771_v22 }
 0x1ee   :  { %v1779_v25 = vadd.f32 %v1231_v23, %v1657_v27  ;;  %v653_v26 = vpop.f32.mrb[25].mxu1 }
 0x1ef   :  { %v1782_v28 = vadd.f32 %v1657_v27, %v653_v26 }
 0x1f0   :  { %720 = vmax.xlane.f32.xlu1 %v1776_v24 }
 0x1f1   :  { %722 = vmax.xlane.f32.xlu0 %v1782_v28 }
 0x1f4   :  { %724 = vmax.xlane.f32.xlu1 %v1779_v25 }
 0x241   :  { %v665_v30 = vpop.xlane.xlu0 %664 }
 0x242   :  { %v727_v31 = vsub.f32 %v1660_v29, %v665_v30 }
 0x244   :  { %v760_v33 = vmul.f32 1.442695, %v727_v31 }
 0x245   :  { %v669_v34 = vpop.xlane.xlu1 %668  ;;  %v663_v36 = vpop.xlane.xlu0 %662 }
 0x246   :  { %1280 = vpow2.f32 %v760_v33  ;;  %v729_v38 = vsub.f32 %v1667_v32, %v669_v34  ;;  %v726_v40 = vsub.f32 %v1664_v57, %v663_v36 }
 0x248   :  { %v764_v42 = vmul.f32 1.442695, %v729_v38  ;;  %v758_v27 = vmul.f32 1.442695, %v726_v40 }
 0x249   :  { %v667_v44 = vpop.xlane.xlu1 %666 }
 0x24a   :  { %1282 = vpow2.f32 %v764_v42  ;;  %v728_v46 = vsub.f32 %v1672_v35, %v667_v44  ;;  %v671_v48 = vpop.xlane.xlu0 %670 }
 0x24b   :  { %1284 = vpow2.f32 %v758_v27  ;;  %v730_v50 = vsub.f32 %v1675_v37, %v671_v48 }
 0x24c   :  { %v762_v52 = vmul.f32 1.442695, %v728_v46 }
 0x24d   :  { %v673_v29 = vpop.xlane.xlu1 %672  ;;  %v766_v59 = vmul.f32 1.442695, %v730_v50 }
 0x24e   :  { %1286 = vpow2.f32 %v762_v52  ;;  %v731_v54 = vsub.f32 %v1680_v39, %v673_v29  ;;  %v675_v56 = vpop.xlane.xlu0 %674 }
 0x24f   :  { %v732_v32 = vsub.f32 %v1683_v41, %v675_v56 }
 0x250   :  { %v1794_v57 = vpop.eup %1280  ;;  %v768_v61 = vmul.f32 1.442695, %v731_v54 }
 0x251   :  { %824 = vadd.xlane.f32.xlu1 %v1794_v57  ;;  %v677_v63 = vpop.xlane.xlu1 %676  ;;  %v770_v37 = vmul.f32 1.442695, %v732_v32 }
 0x252   :  { %1288 = vpow2.f32 %v768_v61  ;;  %v733_v35 = vsub.f32 %v1688_v43, %v677_v63  ;;  %v679_v1 = vpop.xlane.xlu0 %678 }
 0x253   :  { %1290 = vpow2.f32 %v766_v59  ;;  %v734_v3 = vsub.f32 %v1691_v45, %v679_v1 }
 0x254   :  { %v1799_v5 = vpop.eup %1282  ;;  %v772_v39 = vmul.f32 1.442695, %v733_v35 }
 0x255   :  { %v1801_v7 = vpop.eup %1284  ;;  %828 = vadd.xlane.f32.xlu1 %v1799_v5  ;;  %v681_v41 = vpop.xlane.xlu1 %680  ;;  %v774_v43 = vmul.f32 1.442695, %v734_v3 }
 0x256   :  { %1292 = vpow2.f32 %v772_v39  ;;  %v735_v9 = vsub.f32 %v1696_v47, %v681_v41  ;;  %822 = vadd.xlane.f32.xlu0 %v1801_v7  ;;  %v683_v11 = vpop.xlane.xlu0 %682 }
 0x257   :  { %1294 = vpow2.f32 %v770_v37  ;;  %v736_v13 = vsub.f32 %v1699_v49, %v683_v11 }
 0x258   :  { %v1807_v15 = vpop.eup %1286  ;;  %v776_v45 = vmul.f32 1.442695, %v735_v9 }
 0x259   :  { %v685_v17 = vpop.xlane.xlu1 %684  ;;  %v778_v23 = vmul.f32 1.442695, %v736_v13 }
 0x25a   :  { %1296 = vpow2.f32 %v776_v45  ;;  %v737_v19 = vsub.f32 %v1704_v51, %v685_v17  ;;  %826 = vadd.xlane.f32.xlu0 %v1807_v15  ;;  %v687_v21 = vpop.xlane.xlu0 %686 }
 0x25b   :  { %1298 = vpow2.f32 %v774_v43  ;;  %v738_v47 = vsub.f32 %v1707_v53, %v687_v21 }
 0x25c   :  { %v1812_v26 = vpop.eup %1288  ;;  %v780_v30 = vmul.f32 1.442695, %v737_v19 }
 0x25d   :  { %v1814_v31 = vpop.eup %1290  ;;  %832 = vadd.xlane.f32.xlu1 %v1812_v26  ;;  %v689_v49 = vpop.xlane.xlu1 %688  ;;  %v782_v34 = vmul.f32 1.442695, %v738_v47 }
 0x25e   :  { %1300 = vpow2.f32 %v780_v30  ;;  %v739_v33 = vsub.f32 %v1712_v55, %v689_v49  ;;  %830 = vadd.xlane.f32.xlu0 %v1814_v31  ;;  %v691_v51 = vpop.xlane.xlu0 %690 }
 0x25f   :  { %1302 = vpow2.f32 %v778_v23  ;;  %v740_v36 = vsub.f32 %v1715_v58, %v691_v51 }
 0x260   :  { %v1820_v38 = vpop.eup %1292  ;;  %v784_v53 = vmul.f32 1.442695, %v739_v33 }
 0x261   :  { %v1822_v40 = vpop.eup %1294  ;;  %836 = vadd.xlane.f32.xlu1 %v1820_v38  ;;  %v693_v42 = vpop.xlane.xlu1 %692  ;;  %v786_v44 = vmul.f32 1.442695, %v740_v36 }
 0x262   :  { %1304 = vpow2.f32 %v784_v53  ;;  %v741_v27 = vsub.f32 %v1720_v60, %v693_v42  ;;  %834 = vadd.xlane.f32.xlu0 %v1822_v40  ;;  %v695_v55 = vpop.xlane.xlu0 %694 }
 0x263   :  { %1306 = vpow2.f32 %v782_v34  ;;  %v742_v46 = vsub.f32 %v1723_v62, %v695_v55 }
 0x264   :  { %v1828_v48 = vpop.eup %1296  ;;  %v788_v58 = vmul.f32 1.442695, %v741_v27 }
 0x265   :  { %v1830_v50 = vpop.eup %1298  ;;  %840 = vadd.xlane.f32.xlu1 %v1828_v48  ;;  %v697_v52 = vpop.xlane.xlu1 %696  ;;  %v790_v54 = vmul.f32 1.442695, %v742_v46 }
 0x266   :  { %1308 = vpow2.f32 %v788_v58  ;;  %v743_v29 = vsub.f32 %v1728_v0, %v697_v52  ;;  %838 = vadd.xlane.f32.xlu0 %v1830_v50  ;;  %v699_v60 = vpop.xlane.xlu0 %698 }
 0x267   :  { %1310 = vpow2.f32 %v786_v44  ;;  %v744_v56 = vsub.f32 %v1731_v2, %v699_v60 }
 0x268   :  { %v1836_v59 = vpop.eup %1300  ;;  %v792_v62 = vmul.f32 1.442695, %v743_v29 }
 0x269   :  { %v1838_v32 = vpop.eup %1302  ;;  %844 = vadd.xlane.f32.xlu1 %v1836_v59  ;;  %v701_v61 = vpop.xlane.xlu1 %700  ;;  %v794_v35 = vmul.f32 1.442695, %v744_v56 }
 0x26a   :  { %1312 = vpow2.f32 %v792_v62  ;;  %v745_v63 = vsub.f32 %v1736_v4, %v701_v61  ;;  %842 = vadd.xlane.f32.xlu0 %v1838_v32  ;;  %v703_v0 = vpop.xlane.xlu0 %702 }
 0x26b   :  { %1314 = vpow2.f32 %v790_v54  ;;  %v746_v1 = vsub.f32 %v1739_v6, %v703_v0 }
 0x26c   :  { %v1844_v37 = vpop.eup %1304  ;;  %v796_v2 = vmul.f32 1.442695, %v745_v63 }
 0x26d   :  { %v1846_v3 = vpop.eup %1306  ;;  %848 = vadd.xlane.f32.xlu1 %v1844_v37  ;;  %v705_v39 = vpop.xlane.xlu1 %704  ;;  %v798_v9 = vmul.f32 1.442695, %v746_v1 }
 0x26e   :  { %1316 = vpow2.f32 %v796_v2  ;;  %v747_v41 = vsub.f32 %v1744_v8, %v705_v39  ;;  %846 = vadd.xlane.f32.xlu0 %v1846_v3  ;;  %v707_v4 = vpop.xlane.xlu0 %706 }
 0x26f   :  { %1318 = vpow2.f32 %v794_v35  ;;  %v748_v11 = vsub.f32 %v1747_v10, %v707_v4 }
 0x270   :  { %v1852_v43 = vpop.eup %1308  ;;  %v800_v6 = vmul.f32 1.442695, %v747_v41 }
 0x271   :  { %v1854_v13 = vpop.eup %1310  ;;  %852 = vadd.xlane.f32.xlu1 %v1852_v43  ;;  %v709_v45 = vpop.xlane.xlu1 %708  ;;  %v802_v19 = vmul.f32 1.442695, %v748_v11 }
 0x272   :  { %1320 = vpow2.f32 %v800_v6  ;;  %v749_v17 = vsub.f32 %v1752_v12, %v709_v45  ;;  %850 = vadd.xlane.f32.xlu0 %v1854_v13  ;;  %v711_v8 = vpop.xlane.xlu0 %710 }
 0x273   :  { %1322 = vpow2.f32 %v798_v9  ;;  %v750_v21 = vsub.f32 %v1755_v14, %v711_v8 }
 0x274   :  { %v1860_v23 = vpop.eup %1312  ;;  %v804_v10 = vmul.f32 1.442695, %v749_v17 }
 0x275   :  { %v1862_v47 = vpop.eup %1314  ;;  %856 = vadd.xlane.f32.xlu1 %v1860_v23  ;;  %v713_v30 = vpop.xlane.xlu1 %712  ;;  %v806_v33 = vmul.f32 1.442695, %v750_v21 }
 0x276   :  { %1324 = vpow2.f32 %v804_v10  ;;  %v751_v49 = vsub.f32 %v1760_v16, %v713_v30  ;;  %854 = vadd.xlane.f32.xlu0 %v1862_v47  ;;  %v715_v12 = vpop.xlane.xlu0 %714 }
 0x277   :  { %1326 = vpow2.f32 %v802_v19  ;;  %v752_v51 = vsub.f32 %v1763_v18, %v715_v12 }
 0x278   :  { %v1868_v34 = vpop.eup %1316  ;;  %v808_v14 = vmul.f32 1.442695, %v751_v49 }
 0x279   :  { %v1870_v36 = vpop.eup %1318  ;;  %860 = vadd.xlane.f32.xlu1 %v1868_v34  ;;  %v717_v53 = vpop.xlane.xlu1 %716  ;;  %v810_v27 = vmul.f32 1.442695, %v752_v51 }
 0x27a   :  { %1328 = vpow2.f32 %v808_v14  ;;  %v753_v42 = vsub.f32 %v1768_v20, %v717_v53  ;;  %858 = vadd.xlane.f32.xlu0 %v1870_v36  ;;  %v719_v16 = vpop.xlane.xlu0 %718 }
 0x27b   :  { %1330 = vpow2.f32 %v806_v33  ;;  %v754_v55 = vsub.f32 %v1771_v22, %v719_v16 }
 0x27c   :  { %v1876_v44 = vpop.eup %1320  ;;  %v812_v18 = vmul.f32 1.442695, %v753_v42 }
 0x27d   :  { %v1878_v46 = vpop.eup %1322  ;;  %864 = vadd.xlane.f32.xlu1 %v1876_v44  ;;  %v721_v58 = vpop.xlane.xlu1 %720  ;;  %v814_v29 = vmul.f32 1.442695, %v754_v55 }
 0x27e   :  { %1332 = vpow2.f32 %v812_v18  ;;  %v755_v52 = vsub.f32 %v1776_v24, %v721_v58  ;;  %862 = vadd.xlane.f32.xlu0 %v1878_v46  ;;  %v723_v20 = vpop.xlane.xlu0 %722 }
 0x27f   :  { %1334 = vpow2.f32 %v810_v27  ;;  %v756_v60 = vsub.f32 %v1782_v28, %v723_v20 }
 0x280   :  { %v1884_v54 = vpop.eup %1324  ;;  %v816_v22 = vmul.f32 1.442695, %v755_v52 }
 0x281   :  { %v1886_v56 = vpop.eup %1326  ;;  %868 = vadd.xlane.f32.xlu1 %v1884_v54  ;;  %v725_v62 = vpop.xlane.xlu1 %724  ;;  %v818_v24 = vmul.f32 1.442695, %v756_v60 }
 0x282   :  { %1336 = vpow2.f32 %v816_v22  ;;  %v757_v61 = vsub.f32 %v1779_v25, %v725_v62  ;;  %866 = vadd.xlane.f32.xlu0 %v1886_v56 }
 0x283   :  { %1338 = vpow2.f32 %v814_v29 }
 0x284   :  { %v1891_v63 = vpop.eup %1328  ;;  %v820_v0 = vmul.f32 1.442695, %v757_v61 }
 0x285   :  { %v1893_v35 = vpop.eup %1330  ;;  %872 = vadd.xlane.f32.xlu1 %v1891_v63 }
 0x286   :  { %1340 = vpow2.f32 %v820_v0  ;;  %870 = vadd.xlane.f32.xlu0 %v1893_v35 }
 0x287   :  { %1342 = vpow2.f32 %v818_v24 }
 0x288   :  { %v1897_v28 = vpop.eup %1332 }
 0x289   :  { %v1899_v1 = vpop.eup %1334  ;;  %876 = vadd.xlane.f32.xlu1 %v1897_v28 }
 0x28a   :  { %874 = vadd.xlane.f32.xlu0 %v1899_v1 }
 0x28c   :  { %v1903_v25 = vpop.eup %1336 }
 0x28d   :  { %v1905_v2 = vpop.eup %1338  ;;  %880 = vadd.xlane.f32.xlu1 %v1903_v25 }
 0x28e   :  { %878 = vadd.xlane.f32.xlu0 %v1905_v2 }
 0x290   :  { %v1909_v39 = vpop.eup %1340 }
 0x291   :  { %v1911_v41 = vpop.eup %1342  ;;  %884 = vadd.xlane.f32.xlu1 %v1909_v39 }
 0x292   :  { %882 = vadd.xlane.f32.xlu0 %v1911_v41 }
 0x2de   :  { %v825_v4 = vpop.xlane.xlu1 %824 }
 0x2df   :  { %1344 = vrcp.f32 %v825_v4 }
 0x2e2   :  { %v829_v9 = vpop.xlane.xlu1 %828 }
 0x2e3   :  { %1346 = vrcp.f32 %v829_v9  ;;  %v823_v11 = vpop.xlane.xlu0 %822 }
 0x2e4   :  { %1348 = vrcp.f32 %v823_v11 }
 0x2e7   :  { %v827_v6 = vpop.xlane.xlu0 %826 }
 0x2e8   :  { %1350 = vrcp.f32 %v827_v6 }
 0x2e9   :  { %v1345_v45 = vpop.eup %1344 }
 0x2ea   :  { %v919_v17 = vmul.f32 %v1345_v45, %v1794_v57  ;;  %v833_v8 = vpop.xlane.xlu1 %832 }
 0x2eb   :  { %1352 = vrcp.f32 %v833_v8  ;;  %v831_v19 = vpop.xlane.xlu0 %830 }
 0x2ec   :  { %952 = vst.msk [vmem:[%s2080_s5 + $0x8] sm:$0xff] %vm950_vm1, %v919_v17  ;;  %1354 = vrcp.f32 %v831_v19 }
 0x2ed   :  { %v1347_v21 = vpop.eup %1346 }
 0x2ee   :  { %v1349_v10 = vpop.eup %1348  ;;  %v921_v30 = vmul.f32 %v1347_v21, %v1799_v5  ;;  %v837_v49 = vpop.xlane.xlu1 %836 }
 0x2ef   :  { %v918_v12 = vmul.f32 %v1349_v10, %v1801_v7  ;;  %1356 = vrcp.f32 %v837_v49  ;;  %v835_v33 = vpop.xlane.xlu0 %834 }
 0x2f0   :  { %954 = vst.msk [vmem:[%s2080_s5 + $0x18] sm:$0xff] %vm950_vm1, %v921_v30  ;;  %1358 = vrcp.f32 %v835_v33 }
 0x2f1   :  { %951 = vst.msk [vmem:[%s2080_s5] sm:$0xff] %vm950_vm1, %v918_v12 }
 0x2f2   :  { %v1351_v57 = vpop.eup %1350  ;;  %v841_v51 = vpop.xlane.xlu1 %840 }
 0x2f3   :  { %v920_v5 = vmul.f32 %v1351_v57, %v1807_v15  ;;  %1360 = vrcp.f32 %v841_v51  ;;  %v839_v14 = vpop.xlane.xlu0 %838 }
 0x2f4   :  { %1362 = vrcp.f32 %v839_v14 }
 0x2f5   :  { %v1353_v7 = vpop.eup %1352  ;;  %953 = vst.msk [vmem:[%s2080_s5 + $0x10] sm:$0xff] %vm950_vm1, %v920_v5 }
 0x2f6   :  { %v1355_v53 = vpop.eup %1354  ;;  %v923_v42 = vmul.f32 %v1353_v7, %v1812_v26  ;;  %v845_v16 = vpop.xlane.xlu1 %844 }
 0x2f7   :  { %v922_v27 = vmul.f32 %v1355_v53, %v1814_v31  ;;  %1364 = vrcp.f32 %v845_v16  ;;  %v843_v55 = vpop.xlane.xlu0 %842 }
 0x2f8   :  { %956 = vst.msk [vmem:[%s2080_s5 + $0x28] sm:$0xff] %vm950_vm1, %v923_v42  ;;  %1366 = vrcp.f32 %v843_v55 }
 0x2f9   :  { %v1357_v15 = vpop.eup %1356  ;;  %955 = vst.msk [vmem:[%s2080_s5 + $0x20] sm:$0xff] %vm950_vm1, %v922_v27 }
 0x2fa   :  { %v1359_v18 = vpop.eup %1358  ;;  %v925_v26 = vmul.f32 %v1357_v15, %v1820_v38  ;;  %v849_v58 = vpop.xlane.xlu1 %848 }
 0x2fb   :  { %v924_v31 = vmul.f32 %v1359_v18, %v1822_v40  ;;  %1368 = vrcp.f32 %v849_v58  ;;  %v847_v52 = vpop.xlane.xlu0 %846 }
 0x2fc   :  { %958 = vst.msk [vmem:[%s2080_s5 + $0x38] sm:$0xff] %vm950_vm1, %v925_v26  ;;  %1370 = vrcp.f32 %v847_v52 }
 0x2fd   :  { %v1361_v20 = vpop.eup %1360  ;;  %957 = vst.msk [vmem:[%s2080_s5 + $0x30] sm:$0xff] %vm950_vm1, %v924_v31 }
 0x2fe   :  { %v1363_v29 = vpop.eup %1362  ;;  %v927_v38 = vmul.f32 %v1361_v20, %v1828_v48  ;;  %v853_v60 = vpop.xlane.xlu1 %852 }
 0x2ff   :  { %v926_v40 = vmul.f32 %v1363_v29, %v1830_v50  ;;  %1372 = vrcp.f32 %v853_v60  ;;  %v851_v22 = vpop.xlane.xlu0 %850 }
 0x300   :  { %960 = vst.msk [vmem:[%s2080_s5 + $0x48] sm:$0xff] %vm950_vm1, %v927_v38  ;;  %1374 = vrcp.f32 %v851_v22 }
 0x301   :  { %v1365_v62 = vpop.eup %1364  ;;  %959 = vst.msk [vmem:[%s2080_s5 + $0x40] sm:$0xff] %vm950_vm1, %v926_v40 }
 0x302   :  { %v1367_v61 = vpop.eup %1366  ;;  %v929_v48 = vmul.f32 %v1365_v62, %v1836_v59  ;;  %v857_v24 = vpop.xlane.xlu1 %856 }
 0x303   :  { %v928_v50 = vmul.f32 %v1367_v61, %v1838_v32  ;;  %1376 = vrcp.f32 %v857_v24  ;;  %v855_v0 = vpop.xlane.xlu0 %854 }
 0x304   :  { %962 = vst.msk [vmem:[%s2080_s5 + $0x58] sm:$0xff] %vm950_vm1, %v929_v48  ;;  %1378 = vrcp.f32 %v855_v0 }
 0x305   :  { %v1369_v4 = vpop.eup %1368  ;;  %961 = vst.msk [vmem:[%s2080_s5 + $0x50] sm:$0xff] %vm950_vm1, %v928_v50 }
 0x306   :  { %v1371_v9 = vpop.eup %1370  ;;  %v931_v59 = vmul.f32 %v1369_v4, %v1844_v37  ;;  %v861_v11 = vpop.xlane.xlu1 %860 }
 0x307   :  { %v930_v32 = vmul.f32 %v1371_v9, %v1846_v3  ;;  %1380 = vrcp.f32 %v861_v11  ;;  %v859_v6 = vpop.xlane.xlu0 %858 }
 0x308   :  { %964 = vst.msk [vmem:[%s2080_s5 + $0x68] sm:$0xff] %vm950_vm1, %v931_v59  ;;  %1382 = vrcp.f32 %v859_v6 }
 0x309   :  { %v1373_v45 = vpop.eup %1372  ;;  %963 = vst.msk [vmem:[%s2080_s5 + $0x60] sm:$0xff] %vm950_vm1, %v930_v32 }
 0x30a   :  { %v1375_v17 = vpop.eup %1374  ;;  %v933_v37 = vmul.f32 %v1373_v45, %v1852_v43  ;;  %v865_v8 = vpop.xlane.xlu1 %864 }
 0x30b   :  { %v932_v3 = vmul.f32 %v1375_v17, %v1854_v13  ;;  %1384 = vrcp.f32 %v865_v8  ;;  %v863_v19 = vpop.xlane.xlu0 %862 }
 0x30c   :  { %966 = vst.msk [vmem:[%s2080_s5 + $0x78] sm:$0xff] %vm950_vm1, %v933_v37  ;;  %1386 = vrcp.f32 %v863_v19 }
 0x30d   :  { %v1377_v21 = vpop.eup %1376  ;;  %965 = vst.msk [vmem:[%s2080_s5 + $0x70] sm:$0xff] %vm950_vm1, %v932_v3 }
 0x30e   :  { %v1379_v10 = vpop.eup %1378  ;;  %v935_v43 = vmul.f32 %v1377_v21, %v1860_v23  ;;  %v869_v30 = vpop.xlane.xlu1 %868 }
 0x30f   :  { %v934_v13 = vmul.f32 %v1379_v10, %v1862_v47  ;;  %1388 = vrcp.f32 %v869_v30  ;;  %v867_v49 = vpop.xlane.xlu0 %866 }
 0x310   :  { %968 = vst.msk [vmem:[%s2080_s5 + $0x88] sm:$0xff] %vm950_vm1, %v935_v43  ;;  %1390 = vrcp.f32 %v867_v49 }
 0x311   :  { %v1381_v12 = vpop.eup %1380  ;;  %967 = vst.msk [vmem:[%s2080_s5 + $0x80] sm:$0xff] %vm950_vm1, %v934_v13 }
 0x312   :  { %v1383_v33 = vpop.eup %1382  ;;  %v937_v23 = vmul.f32 %v1381_v12, %v1868_v34  ;;  %v873_v57 = vpop.xlane.xlu1 %872 }
 0x313   :  { %v936_v47 = vmul.f32 %v1383_v33, %v1870_v36  ;;  %1392 = vrcp.f32 %v873_v57  ;;  %v871_v51 = vpop.xlane.xlu0 %870 }
 0x314   :  { %970 = vst.msk [vmem:[%s2080_s5 + $0x98] sm:$0xff] %vm950_vm1, %v937_v23  ;;  %1394 = vrcp.f32 %v871_v51 }
 0x315   :  { %v1385_v5 = vpop.eup %1384  ;;  %969 = vst.msk [vmem:[%s2080_s5 + $0x90] sm:$0xff] %vm950_vm1, %v936_v47 }
 0x316   :  { %v1387_v14 = vpop.eup %1386  ;;  %v939_v34 = vmul.f32 %v1385_v5, %v1876_v44  ;;  %v877_v7 = vpop.xlane.xlu1 %876 }
 0x317   :  { %v938_v36 = vmul.f32 %v1387_v14, %v1878_v46  ;;  %1396 = vrcp.f32 %v877_v7  ;;  %v875_v53 = vpop.xlane.xlu0 %874 }
 0x318   :  { %972 = vst.msk [vmem:[%s2080_s5 + $0xa8] sm:$0xff] %vm950_vm1, %v939_v34  ;;  %1398 = vrcp.f32 %v875_v53 }
 0x319   :  { %v1389_v42 = vpop.eup %1388  ;;  %971 = vst.msk [vmem:[%s2080_s5 + $0xa0] sm:$0xff] %vm950_vm1, %v938_v36 }
 0x31a   :  { %v1391_v16 = vpop.eup %1390  ;;  %v941_v44 = vmul.f32 %v1389_v42, %v1884_v54  ;;  %v881_v27 = vpop.xlane.xlu1 %880 }
 0x31b   :  { %v940_v46 = vmul.f32 %v1391_v16, %v1886_v56  ;;  %1400 = vrcp.f32 %v881_v27  ;;  %v879_v55 = vpop.xlane.xlu0 %878 }
 0x31c   :  { %974 = vst.msk [vmem:[%s2080_s5 + $0xb8] sm:$0xff] %vm950_vm1, %v941_v44  ;;  %1402 = vrcp.f32 %v879_v55 }
 0x31d   :  { %v1393_v15 = vpop.eup %1392  ;;  %973 = vst.msk [vmem:[%s2080_s5 + $0xb0] sm:$0xff] %vm950_vm1, %v940_v46 }
 0x31e   :  { %v1395_v18 = vpop.eup %1394  ;;  %v943_v54 = vmul.f32 %v1393_v15, %v1891_v63  ;;  %v885_v26 = vpop.xlane.xlu1 %884 }
 0x31f   :  { %v942_v56 = vmul.f32 %v1395_v18, %v1893_v35  ;;  %1404 = vrcp.f32 %v885_v26  ;;  %v883_v58 = vpop.xlane.xlu0 %882 }
 0x320   :  { %976 = vst.msk [vmem:[%s2080_s5 + $0xc8] sm:$0xff] %vm950_vm1, %v943_v54  ;;  %1406 = vrcp.f32 %v883_v58 }
 0x321   :  { %v1397_v31 = vpop.eup %1396  ;;  %975 = vst.msk [vmem:[%s2080_s5 + $0xc0] sm:$0xff] %vm950_vm1, %v942_v56 }
 0x322   :  { %v1399_v52 = vpop.eup %1398  ;;  %v945_v63 = vmul.f32 %v1397_v31, %v1897_v28 }
 0x323   :  { %v944_v20 = vmul.f32 %v1399_v52, %v1899_v1 }
 0x324   :  { %978 = vst.msk [vmem:[%s2080_s5 + $0xd8] sm:$0xff] %vm950_vm1, %v945_v63 }
 0x325   :  { %v1401_v35 = vpop.eup %1400  ;;  %977 = vst.msk [vmem:[%s2080_s5 + $0xd0] sm:$0xff] %vm950_vm1, %v944_v20 }
 0x326   :  { %v1403_v29 = vpop.eup %1402  ;;  %v947_v38 = vmul.f32 %v1401_v35, %v1903_v25 }
 0x327   :  { %v946_v60 = vmul.f32 %v1403_v29, %v1905_v2 }
 0x328   :  { %980 = vst.msk [vmem:[%s2080_s5 + $0xe8] sm:$0xff] %vm950_vm1, %v947_v38 }
 0x329   :  { %v1405_v28 = vpop.eup %1404  ;;  %979 = vst.msk [vmem:[%s2080_s5 + $0xe0] sm:$0xff] %vm950_vm1, %v946_v60 }
 0x32a   :  { %v1407_v1 = vpop.eup %1406  ;;  %v949_v40 = vmul.f32 %v1405_v28, %v1909_v39 }
 0x32b   :  { %v948_v22 = vmul.f32 %v1407_v1, %v1911_v41 }
 0x32c   :  { %982 = vst.msk [vmem:[%s2080_s5 + $0xf8] sm:$0xff] %vm950_vm1, %v949_v40 }
 0x32d   :  { %981 = vst.msk [vmem:[%s2080_s5 + $0xf0] sm:$0xff] %vm950_vm1, %v948_v22 }

</bundles_post_ra>
